<compile_context>
chip_gen: v7x
topology: tpu7x:2x2x1
jax: 0.10.0
libtpu: 0.0.40
codegen_flags: <defaults>
</compile_context>

<pallas_src>
import functools

import jax
import jax.numpy as jnp
from jax.experimental import pallas as pl
from jax.experimental.pallas import tpu as pltpu


def gru_mlp_kernel(x_ref, wih_ref, whh_ref, bias_ref, wc_ref, bc_ref, out_ref,
                   *, seq_len, batch, hidden):
    B, H = batch, hidden

    x2d = x_ref[...]                                   # (S*B, I)
    wih = wih_ref[...]                                 # (I, 3H)
    whh = whh_ref[...]                                 # (H, 3H)
    bias = bias_ref[...]                               # (2, 3H)

    # ---- Prologue: fused input projection for ALL timesteps + folded input biases.
    gi = jnp.dot(x2d, wih, preferred_element_type=jnp.float32) + bias[0:1, :]   # (S*B, 3H)

    # Hoist the n-gate hidden-bias broadcast (zeros on r/z lanes) out of the loop.
    bhn_b = jnp.broadcast_to(bias[1:2, :], (B, 3 * H))

    # PyTorch default: h0 = 0. Hidden state and its history live entirely in vregs.
    h = jnp.zeros((B, H), jnp.float32)
    h_list = []

    # ---- Recurrence: fully unrolled (S is small). One fused MXU matmul + one sigmoid
    # + one tanh per step on the serial path.
    for t in range(seq_len):
        lo = t * B
        gh = jnp.dot(h, whh, preferred_element_type=jnp.float32) + bhn_b        # (B, 3H)
        gi_t = gi[lo:lo + B, :]                                                  # (B, 3H)
        rz = jax.nn.sigmoid(gi_t[:, 0:2 * H] + gh[:, 0:2 * H])                   # r|z fused
        r = rz[:, 0:H]
        z = rz[:, H:2 * H]
        n = jnp.tanh(gi_t[:, 2 * H:3 * H] + r * gh[:, 2 * H:3 * H])
        h = (1.0 - z) * n + z * h
        h_list.append(h)

    # ---- Epilogue: folded linear1@linear2 over the whole h history, one matmul, one store.
    hs = jnp.concatenate(h_list, axis=0)               # (S*B, H), never round-trips VMEM
    y = jnp.dot(hs, wc_ref[...], preferred_element_type=jnp.float32) + bc_ref[...]
    out_ref[...] = y.astype(out_ref.dtype)


def gru_rnn_forward(x, w_ih, w_hh, b_ih, b_hh, w1, b1, w2, b2):
    """x: (S, B, I). Parameters in PyTorch layout:
       w_ih (3H, I), w_hh (3H, H), b_ih/b_hh (3H,) with gate order (r, z, n),
       w1 (16, H), b1 (16,), w2 (O, 16), b2 (O,). Returns (S, B, O)."""
    S, B, I = x.shape
    H = w_hh.shape[1]
    O = w2.shape[0]

    # --- one-time wrapper-side re-layout / folding.
    wih_cat = jnp.transpose(w_ih)                       # (I, 3H), gate blocks [r|z|n]
    whh_cat = jnp.transpose(w_hh)                       # (H, 3H)

    b_gi = jnp.concatenate([b_ih[0:H] + b_hh[0:H],      # r: b_ir + b_hr
                            b_ih[H:2 * H] + b_hh[H:2 * H],   # z: b_iz + b_hz
                            b_ih[2 * H:3 * H]]).reshape(1, 3 * H)   # n: b_in only
    b_gh = jnp.concatenate([jnp.zeros((2 * H,), jnp.float32),
                            b_hh[2 * H:3 * H]]).reshape(1, 3 * H)   # n: b_hn inside r*(.)
    bias = jnp.concatenate([b_gi, b_gh], axis=0)        # (2, 3H)

    # Fold linear1 @ linear2 (exact: no activation between them in the module).
    wc = jnp.transpose(w1) @ jnp.transpose(w2)          # (H, O)
    bc = (b1 @ jnp.transpose(w2) + b2).reshape(1, O)    # (1, O)

    x2d = x.reshape(S * B, I)                           # same flattening as x.view(s*b, h)

    vmem = pl.BlockSpec(memory_space=pltpu.MemorySpace.VMEM)
    kernel = functools.partial(gru_mlp_kernel, seq_len=S, batch=B, hidden=H)

    out2d = pl.pallas_call(
        kernel,
        out_shape=jax.ShapeDtypeStruct((S * B, O), jnp.float32),
        in_specs=[vmem] * 6,
        out_specs=vmem,
    )(x2d, wih_cat, whh_cat, bias, wc, bc)

    return out2d.reshape(S, B, O)


def ref_forward(x, w_ih, w_hh, b_ih, b_hh, w1, b1, w2, b2):
    """Pure-JAX reference (lax.scan) mirroring PyTorch GRU + Linear stack."""
    S, B, I = x.shape
    H = w_hh.shape[1]
    wih_t = w_ih.T                                      # (I, 3H)
    whh_t = w_hh.T                                      # (H, 3H)

    def step(h, x_t):
        gi = x_t @ wih_t + b_ih
        gh = h @ whh_t + b_hh
        r = jax.nn.sigmoid(gi[:, 0:H] + gh[:, 0:H])
        z = jax.nn.sigmoid(gi[:, H:2 * H] + gh[:, H:2 * H])
        n = jnp.tanh(gi[:, 2 * H:3 * H] + r * gh[:, 2 * H:3 * H])
        h_new = (1.0 - z) * n + z * h
        y = (h_new @ w1.T + b1) @ w2.T + b2
        return h_new, y

    h0 = jnp.zeros((B, H), jnp.float32)
    _, ys = jax.lax.scan(step, h0, x)
    return ys


if __name__ == "__main__":
    # GruRNN(input_size=8, hidden_size=32, output_size=4, num_layers=1), seq=8, batch=2.
    S, B, I, H, O = 8, 2, 8, 32, 4

    key = jax.random.PRNGKey(0)
    ks = jax.random.split(key, 10)

    def unif(k, shape, bound):
        return jax.random.uniform(k, shape, jnp.float32, -bound, bound)

    # Deterministic init mimicking PyTorch's uniform(-1/sqrt(fan), 1/sqrt(fan)),
    # parameters kept in native PyTorch layout (gate order r, z, n).
    k_gru = 1.0 / jnp.sqrt(H)
    w_ih = unif(ks[0], (3 * H, I), k_gru)      # weight_ih_l0
    w_hh = unif(ks[1], (3 * H, H), k_gru)      # weight_hh_l0
    b_ih = unif(ks[2], (3 * H,), k_gru)        # bias_ih_l0
    b_hh = unif(ks[3], (3 * H,), k_gru)        # bias_hh_l0

    k_l1 = 1.0 / jnp.sqrt(H)
    w1 = unif(ks[4], (16, H), k_l1)            # linear1.weight
    b1 = unif(ks[5], (16,), k_l1)              # linear1.bias

    k_l2 = 1.0 / jnp.sqrt(16.0)
    w2 = unif(ks[6], (O, 16), k_l2)            # linear2.weight
    b2 = unif(ks[7], (O,), k_l2)               # linear2.bias

    x = jax.random.normal(ks[8], (S, B, I), jnp.float32)

    out = gru_rnn_forward(x, w_ih, w_hh, b_ih, b_hh, w1, b1, w2, b2)
    out = jax.block_until_ready(out)

    ref = ref_forward(x, w_ih, w_hh, b_ih, b_hh, w1, b1, w2, b2)
    ref = jax.block_until_ready(ref)

    assert out.shape == (S, B, O), out.shape
    assert jnp.allclose(out, ref, atol=1e-5, rtol=1e-5), float(jnp.max(jnp.abs(out - ref)))

    print("KERNEL_OK")
</pallas_src>

<mosaic_0001>
module attributes {stable_mosaic.version = 11 : i64} {
  func.func @gru_mlp_kernel(%arg0: memref<16x8xf32, #tpu.memory_space<vmem>>, %arg1: memref<8x96xf32, #tpu.memory_space<vmem>>, %arg2: memref<32x96xf32, #tpu.memory_space<vmem>>, %arg3: memref<2x96xf32, #tpu.memory_space<vmem>>, %arg4: memref<32x4xf32, #tpu.memory_space<vmem>>, %arg5: memref<1x4xf32, #tpu.memory_space<vmem>>, %arg6: memref<16x4xf32, #tpu.memory_space<vmem>>) attributes {dimension_semantics = [], scalar_prefetch = 0 : i64, scratch_operands = 0 : i64, tpu.core_type = #tpu.core_type<tc>} {
    %c0 = arith.constant 0 : index
    %c0_0 = arith.constant 0 : index
    %0 = vector.load %arg0[%c0, %c0_0] : memref<16x8xf32, #tpu.memory_space<vmem>>, vector<16x8xf32>
    %c0_1 = arith.constant 0 : index
    %c0_2 = arith.constant 0 : index
    %1 = vector.load %arg1[%c0_1, %c0_2] : memref<8x96xf32, #tpu.memory_space<vmem>>, vector<8x96xf32>
    %c0_3 = arith.constant 0 : index
    %c0_4 = arith.constant 0 : index
    %2 = vector.load %arg2[%c0_3, %c0_4] : memref<32x96xf32, #tpu.memory_space<vmem>>, vector<32x96xf32>
    %c0_5 = arith.constant 0 : index
    %c0_6 = arith.constant 0 : index
    %3 = vector.load %arg3[%c0_5, %c0_6] : memref<2x96xf32, #tpu.memory_space<vmem>>, vector<2x96xf32>
    %cst = arith.constant dense<0.000000e+00> : vector<16x96xf32>
    %4 = tpu.matmul %0, %1, %cst {dimension_numbers = #tpu.dot_dimension_numbers<[1], [0], [0], [1], [0, 0, 1, 1], [], []>} : vector<16x8xf32>, vector<8x96xf32>, vector<16x96xf32> -> vector<16x96xf32>
    %5 = vector.extract_strided_slice %3 {offsets = [0, 0], sizes = [1, 96], strides = [1, 1]} : vector<2x96xf32> to vector<1x96xf32>
    %6 = vector.broadcast %5 : vector<1x96xf32> to vector<16x96xf32>
    %7 = arith.addf %4, %6 : vector<16x96xf32>
    %8 = vector.extract_strided_slice %3 {offsets = [1, 0], sizes = [1, 96], strides = [1, 1]} : vector<2x96xf32> to vector<1x96xf32>
    %9 = vector.shape_cast %8 : vector<1x96xf32> to vector<1x96xf32>
    %10 = vector.broadcast %9 : vector<1x96xf32> to vector<2x96xf32>
    %cst_7 = arith.constant 0.000000e+00 : f32
    %11 = vector.broadcast %cst_7 : f32 to vector<2x32xf32>
    %cst_8 = arith.constant dense<0.000000e+00> : vector<2x96xf32>
    %12 = tpu.matmul %11, %2, %cst_8 {dimension_numbers = #tpu.dot_dimension_numbers<[1], [0], [0], [1], [0, 0, 1, 1], [], []>} : vector<2x32xf32>, vector<32x96xf32>, vector<2x96xf32> -> vector<2x96xf32>
    %13 = arith.addf %12, %10 : vector<2x96xf32>
    %14 = vector.extract_strided_slice %7 {offsets = [0, 0], sizes = [2, 96], strides = [1, 1]} : vector<16x96xf32> to vector<2x96xf32>
    %15 = vector.extract_strided_slice %14 {offsets = [0, 0], sizes = [2, 64], strides = [1, 1]} : vector<2x96xf32> to vector<2x64xf32>
    %16 = vector.extract_strided_slice %13 {offsets = [0, 0], sizes = [2, 64], strides = [1, 1]} : vector<2x96xf32> to vector<2x64xf32>
    %17 = arith.addf %15, %16 : vector<2x64xf32>
    %18 = arith.negf %17 : vector<2x64xf32>
    %19 = math.exp %18 : vector<2x64xf32>
    %cst_9 = arith.constant 1.000000e+00 : f32
    %20 = vector.broadcast %cst_9 : f32 to vector<2x64xf32>
    %21 = arith.addf %20, %19 : vector<2x64xf32>
    %22 = arith.divf %20, %21 : vector<2x64xf32>
    %23 = vector.extract_strided_slice %22 {offsets = [0, 0], sizes = [2, 32], strides = [1, 1]} : vector<2x64xf32> to vector<2x32xf32>
    %24 = vector.extract_strided_slice %22 {offsets = [0, 32], sizes = [2, 32], strides = [1, 1]} : vector<2x64xf32> to vector<2x32xf32>
    %25 = vector.extract_strided_slice %14 {offsets = [0, 64], sizes = [2, 32], strides = [1, 1]} : vector<2x96xf32> to vector<2x32xf32>
    %26 = vector.extract_strided_slice %13 {offsets = [0, 64], sizes = [2, 32], strides = [1, 1]} : vector<2x96xf32> to vector<2x32xf32>
    %27 = arith.mulf %23, %26 : vector<2x32xf32>
    %28 = arith.addf %25, %27 : vector<2x32xf32>
    %29 = math.tanh %28 : vector<2x32xf32>
    %cst_10 = arith.constant 1.000000e+00 : f32
    %30 = vector.broadcast %cst_10 : f32 to vector<2x32xf32>
    %31 = arith.subf %30, %24 : vector<2x32xf32>
    %32 = arith.mulf %31, %29 : vector<2x32xf32>
    %33 = arith.mulf %24, %11 : vector<2x32xf32>
    %34 = arith.addf %32, %33 : vector<2x32xf32>
    %cst_11 = arith.constant dense<0.000000e+00> : vector<2x96xf32>
    %35 = tpu.matmul %34, %2, %cst_11 {dimension_numbers = #tpu.dot_dimension_numbers<[1], [0], [0], [1], [0, 0, 1, 1], [], []>} : vector<2x32xf32>, vector<32x96xf32>, vector<2x96xf32> -> vector<2x96xf32>
    %36 = arith.addf %35, %10 : vector<2x96xf32>
    %37 = vector.extract_strided_slice %7 {offsets = [2, 0], sizes = [2, 96], strides = [1, 1]} : vector<16x96xf32> to vector<2x96xf32>
    %38 = vector.extract_strided_slice %37 {offsets = [0, 0], sizes = [2, 64], strides = [1, 1]} : vector<2x96xf32> to vector<2x64xf32>
    %39 = vector.extract_strided_slice %36 {offsets = [0, 0], sizes = [2, 64], strides = [1, 1]} : vector<2x96xf32> to vector<2x64xf32>
    %40 = arith.addf %38, %39 : vector<2x64xf32>
    %41 = arith.negf %40 : vector<2x64xf32>
    %42 = math.exp %41 : vector<2x64xf32>
    %cst_12 = arith.constant 1.000000e+00 : f32
    %43 = vector.broadcast %cst_12 : f32 to vector<2x64xf32>
    %44 = arith.addf %43, %42 : vector<2x64xf32>
    %45 = arith.divf %43, %44 : vector<2x64xf32>
    %46 = vector.extract_strided_slice %45 {offsets = [0, 0], sizes = [2, 32], strides = [1, 1]} : vector<2x64xf32> to vector<2x32xf32>
    %47 = vector.extract_strided_slice %45 {offsets = [0, 32], sizes = [2, 32], strides = [1, 1]} : vector<2x64xf32> to vector<2x32xf32>
    %48 = vector.extract_strided_slice %37 {offsets = [0, 64], sizes = [2, 32], strides = [1, 1]} : vector<2x96xf32> to vector<2x32xf32>
    %49 = vector.extract_strided_slice %36 {offsets = [0, 64], sizes = [2, 32], strides = [1, 1]} : vector<2x96xf32> to vector<2x32xf32>
    %50 = arith.mulf %46, %49 : vector<2x32xf32>
    %51 = arith.addf %48, %50 : vector<2x32xf32>
    %52 = math.tanh %51 : vector<2x32xf32>
    %cst_13 = arith.constant 1.000000e+00 : f32
    %53 = vector.broadcast %cst_13 : f32 to vector<2x32xf32>
    %54 = arith.subf %53, %47 : vector<2x32xf32>
    %55 = arith.mulf %54, %52 : vector<2x32xf32>
    %56 = arith.mulf %47, %34 : vector<2x32xf32>
    %57 = arith.addf %55, %56 : vector<2x32xf32>
    %cst_14 = arith.constant dense<0.000000e+00> : vector<2x96xf32>
    %58 = tpu.matmul %57, %2, %cst_14 {dimension_numbers = #tpu.dot_dimension_numbers<[1], [0], [0], [1], [0, 0, 1, 1], [], []>} : vector<2x32xf32>, vector<32x96xf32>, vector<2x96xf32> -> vector<2x96xf32>
    %59 = arith.addf %58, %10 : vector<2x96xf32>
    %60 = vector.extract_strided_slice %7 {offsets = [4, 0], sizes = [2, 96], strides = [1, 1]} : vector<16x96xf32> to vector<2x96xf32>
    %61 = vector.extract_strided_slice %60 {offsets = [0, 0], sizes = [2, 64], strides = [1, 1]} : vector<2x96xf32> to vector<2x64xf32>
    %62 = vector.extract_strided_slice %59 {offsets = [0, 0], sizes = [2, 64], strides = [1, 1]} : vector<2x96xf32> to vector<2x64xf32>
    %63 = arith.addf %61, %62 : vector<2x64xf32>
    %64 = arith.negf %63 : vector<2x64xf32>
    %65 = math.exp %64 : vector<2x64xf32>
    %cst_15 = arith.constant 1.000000e+00 : f32
    %66 = vector.broadcast %cst_15 : f32 to vector<2x64xf32>
    %67 = arith.addf %66, %65 : vector<2x64xf32>
    %68 = arith.divf %66, %67 : vector<2x64xf32>
    %69 = vector.extract_strided_slice %68 {offsets = [0, 0], sizes = [2, 32], strides = [1, 1]} : vector<2x64xf32> to vector<2x32xf32>
    %70 = vector.extract_strided_slice %68 {offsets = [0, 32], sizes = [2, 32], strides = [1, 1]} : vector<2x64xf32> to vector<2x32xf32>
    %71 = vector.extract_strided_slice %60 {offsets = [0, 64], sizes = [2, 32], strides = [1, 1]} : vector<2x96xf32> to vector<2x32xf32>
    %72 = vector.extract_strided_slice %59 {offsets = [0, 64], sizes = [2, 32], strides = [1, 1]} : vector<2x96xf32> to vector<2x32xf32>
    %73 = arith.mulf %69, %72 : vector<2x32xf32>
    %74 = arith.addf %71, %73 : vector<2x32xf32>
    %75 = math.tanh %74 : vector<2x32xf32>
    %cst_16 = arith.constant 1.000000e+00 : f32
    %76 = vector.broadcast %cst_16 : f32 to vector<2x32xf32>
    %77 = arith.subf %76, %70 : vector<2x32xf32>
    %78 = arith.mulf %77, %75 : vector<2x32xf32>
    %79 = arith.mulf %70, %57 : vector<2x32xf32>
    %80 = arith.addf %78, %79 : vector<2x32xf32>
    %cst_17 = arith.constant dense<0.000000e+00> : vector<2x96xf32>
    %81 = tpu.matmul %80, %2, %cst_17 {dimension_numbers = #tpu.dot_dimension_numbers<[1], [0], [0], [1], [0, 0, 1, 1], [], []>} : vector<2x32xf32>, vector<32x96xf32>, vector<2x96xf32> -> vector<2x96xf32>
    %82 = arith.addf %81, %10 : vector<2x96xf32>
    %83 = vector.extract_strided_slice %7 {offsets = [6, 0], sizes = [2, 96], strides = [1, 1]} : vector<16x96xf32> to vector<2x96xf32>
    %84 = vector.extract_strided_slice %83 {offsets = [0, 0], sizes = [2, 64], strides = [1, 1]} : vector<2x96xf32> to vector<2x64xf32>
    %85 = vector.extract_strided_slice %82 {offsets = [0, 0], sizes = [2, 64], strides = [1, 1]} : vector<2x96xf32> to vector<2x64xf32>
    %86 = arith.addf %84, %85 : vector<2x64xf32>
    %87 = arith.negf %86 : vector<2x64xf32>
    %88 = math.exp %87 : vector<2x64xf32>
    %cst_18 = arith.constant 1.000000e+00 : f32
    %89 = vector.broadcast %cst_18 : f32 to vector<2x64xf32>
    %90 = arith.addf %89, %88 : vector<2x64xf32>
    %91 = arith.divf %89, %90 : vector<2x64xf32>
    %92 = vector.extract_strided_slice %91 {offsets = [0, 0], sizes = [2, 32], strides = [1, 1]} : vector<2x64xf32> to vector<2x32xf32>
    %93 = vector.extract_strided_slice %91 {offsets = [0, 32], sizes = [2, 32], strides = [1, 1]} : vector<2x64xf32> to vector<2x32xf32>
    %94 = vector.extract_strided_slice %83 {offsets = [0, 64], sizes = [2, 32], strides = [1, 1]} : vector<2x96xf32> to vector<2x32xf32>
    %95 = vector.extract_strided_slice %82 {offsets = [0, 64], sizes = [2, 32], strides = [1, 1]} : vector<2x96xf32> to vector<2x32xf32>
    %96 = arith.mulf %92, %95 : vector<2x32xf32>
    %97 = arith.addf %94, %96 : vector<2x32xf32>
    %98 = math.tanh %97 : vector<2x32xf32>
    %cst_19 = arith.constant 1.000000e+00 : f32
    %99 = vector.broadcast %cst_19 : f32 to vector<2x32xf32>
    %100 = arith.subf %99, %93 : vector<2x32xf32>
    %101 = arith.mulf %100, %98 : vector<2x32xf32>
    %102 = arith.mulf %93, %80 : vector<2x32xf32>
    %103 = arith.addf %101, %102 : vector<2x32xf32>
    %cst_20 = arith.constant dense<0.000000e+00> : vector<2x96xf32>
    %104 = tpu.matmul %103, %2, %cst_20 {dimension_numbers = #tpu.dot_dimension_numbers<[1], [0], [0], [1], [0, 0, 1, 1], [], []>} : vector<2x32xf32>, vector<32x96xf32>, vector<2x96xf32> -> vector<2x96xf32>
    %105 = arith.addf %104, %10 : vector<2x96xf32>
    %106 = vector.extract_strided_slice %7 {offsets = [8, 0], sizes = [2, 96], strides = [1, 1]} : vector<16x96xf32> to vector<2x96xf32>
    %107 = vector.extract_strided_slice %106 {offsets = [0, 0], sizes = [2, 64], strides = [1, 1]} : vector<2x96xf32> to vector<2x64xf32>
    %108 = vector.extract_strided_slice %105 {offsets = [0, 0], sizes = [2, 64], strides = [1, 1]} : vector<2x96xf32> to vector<2x64xf32>
    %109 = arith.addf %107, %108 : vector<2x64xf32>
    %110 = arith.negf %109 : vector<2x64xf32>
    %111 = math.exp %110 : vector<2x64xf32>
    %cst_21 = arith.constant 1.000000e+00 : f32
    %112 = vector.broadcast %cst_21 : f32 to vector<2x64xf32>
    %113 = arith.addf %112, %111 : vector<2x64xf32>
    %114 = arith.divf %112, %113 : vector<2x64xf32>
    %115 = vector.extract_strided_slice %114 {offsets = [0, 0], sizes = [2, 32], strides = [1, 1]} : vector<2x64xf32> to vector<2x32xf32>
    %116 = vector.extract_strided_slice %114 {offsets = [0, 32], sizes = [2, 32], strides = [1, 1]} : vector<2x64xf32> to vector<2x32xf32>
    %117 = vector.extract_strided_slice %106 {offsets = [0, 64], sizes = [2, 32], strides = [1, 1]} : vector<2x96xf32> to vector<2x32xf32>
    %118 = vector.extract_strided_slice %105 {offsets = [0, 64], sizes = [2, 32], strides = [1, 1]} : vector<2x96xf32> to vector<2x32xf32>
    %119 = arith.mulf %115, %118 : vector<2x32xf32>
    %120 = arith.addf %117, %119 : vector<2x32xf32>
    %121 = math.tanh %120 : vector<2x32xf32>
    %cst_22 = arith.constant 1.000000e+00 : f32
    %122 = vector.broadcast %cst_22 : f32 to vector<2x32xf32>
    %123 = arith.subf %122, %116 : vector<2x32xf32>
    %124 = arith.mulf %123, %121 : vector<2x32xf32>
    %125 = arith.mulf %116, %103 : vector<2x32xf32>
    %126 = arith.addf %124, %125 : vector<2x32xf32>
    %cst_23 = arith.constant dense<0.000000e+00> : vector<2x96xf32>
    %127 = tpu.matmul %126, %2, %cst_23 {dimension_numbers = #tpu.dot_dimension_numbers<[1], [0], [0], [1], [0, 0, 1, 1], [], []>} : vector<2x32xf32>, vector<32x96xf32>, vector<2x96xf32> -> vector<2x96xf32>
    %128 = arith.addf %127, %10 : vector<2x96xf32>
    %129 = vector.extract_strided_slice %7 {offsets = [10, 0], sizes = [2, 96], strides = [1, 1]} : vector<16x96xf32> to vector<2x96xf32>
    %130 = vector.extract_strided_slice %129 {offsets = [0, 0], sizes = [2, 64], strides = [1, 1]} : vector<2x96xf32> to vector<2x64xf32>
    %131 = vector.extract_strided_slice %128 {offsets = [0, 0], sizes = [2, 64], strides = [1, 1]} : vector<2x96xf32> to vector<2x64xf32>
    %132 = arith.addf %130, %131 : vector<2x64xf32>
    %133 = arith.negf %132 : vector<2x64xf32>
    %134 = math.exp %133 : vector<2x64xf32>
    %cst_24 = arith.constant 1.000000e+00 : f32
    %135 = vector.broadcast %cst_24 : f32 to vector<2x64xf32>
    %136 = arith.addf %135, %134 : vector<2x64xf32>
    %137 = arith.divf %135, %136 : vector<2x64xf32>
    %138 = vector.extract_strided_slice %137 {offsets = [0, 0], sizes = [2, 32], strides = [1, 1]} : vector<2x64xf32> to vector<2x32xf32>
    %139 = vector.extract_strided_slice %137 {offsets = [0, 32], sizes = [2, 32], strides = [1, 1]} : vector<2x64xf32> to vector<2x32xf32>
    %140 = vector.extract_strided_slice %129 {offsets = [0, 64], sizes = [2, 32], strides = [1, 1]} : vector<2x96xf32> to vector<2x32xf32>
    %141 = vector.extract_strided_slice %128 {offsets = [0, 64], sizes = [2, 32], strides = [1, 1]} : vector<2x96xf32> to vector<2x32xf32>
    %142 = arith.mulf %138, %141 : vector<2x32xf32>
    %143 = arith.addf %140, %142 : vector<2x32xf32>
    %144 = math.tanh %143 : vector<2x32xf32>
    %cst_25 = arith.constant 1.000000e+00 : f32
    %145 = vector.broadcast %cst_25 : f32 to vector<2x32xf32>
    %146 = arith.subf %145, %139 : vector<2x32xf32>
    %147 = arith.mulf %146, %144 : vector<2x32xf32>
    %148 = arith.mulf %139, %126 : vector<2x32xf32>
    %149 = arith.addf %147, %148 : vector<2x32xf32>
    %cst_26 = arith.constant dense<0.000000e+00> : vector<2x96xf32>
    %150 = tpu.matmul %149, %2, %cst_26 {dimension_numbers = #tpu.dot_dimension_numbers<[1], [0], [0], [1], [0, 0, 1, 1], [], []>} : vector<2x32xf32>, vector<32x96xf32>, vector<2x96xf32> -> vector<2x96xf32>
    %151 = arith.addf %150, %10 : vector<2x96xf32>
    %152 = vector.extract_strided_slice %7 {offsets = [12, 0], sizes = [2, 96], strides = [1, 1]} : vector<16x96xf32> to vector<2x96xf32>
    %153 = vector.extract_strided_slice %152 {offsets = [0, 0], sizes = [2, 64], strides = [1, 1]} : vector<2x96xf32> to vector<2x64xf32>
    %154 = vector.extract_strided_slice %151 {offsets = [0, 0], sizes = [2, 64], strides = [1, 1]} : vector<2x96xf32> to vector<2x64xf32>
    %155 = arith.addf %153, %154 : vector<2x64xf32>
    %156 = arith.negf %155 : vector<2x64xf32>
    %157 = math.exp %156 : vector<2x64xf32>
    %cst_27 = arith.constant 1.000000e+00 : f32
    %158 = vector.broadcast %cst_27 : f32 to vector<2x64xf32>
    %159 = arith.addf %158, %157 : vector<2x64xf32>
    %160 = arith.divf %158, %159 : vector<2x64xf32>
    %161 = vector.extract_strided_slice %160 {offsets = [0, 0], sizes = [2, 32], strides = [1, 1]} : vector<2x64xf32> to vector<2x32xf32>
    %162 = vector.extract_strided_slice %160 {offsets = [0, 32], sizes = [2, 32], strides = [1, 1]} : vector<2x64xf32> to vector<2x32xf32>
    %163 = vector.extract_strided_slice %152 {offsets = [0, 64], sizes = [2, 32], strides = [1, 1]} : vector<2x96xf32> to vector<2x32xf32>
    %164 = vector.extract_strided_slice %151 {offsets = [0, 64], sizes = [2, 32], strides = [1, 1]} : vector<2x96xf32> to vector<2x32xf32>
    %165 = arith.mulf %161, %164 : vector<2x32xf32>
    %166 = arith.addf %163, %165 : vector<2x32xf32>
    %167 = math.tanh %166 : vector<2x32xf32>
    %cst_28 = arith.constant 1.000000e+00 : f32
    %168 = vector.broadcast %cst_28 : f32 to vector<2x32xf32>
    %169 = arith.subf %168, %162 : vector<2x32xf32>
    %170 = arith.mulf %169, %167 : vector<2x32xf32>
    %171 = arith.mulf %162, %149 : vector<2x32xf32>
    %172 = arith.addf %170, %171 : vector<2x32xf32>
    %cst_29 = arith.constant dense<0.000000e+00> : vector<2x96xf32>
    %173 = tpu.matmul %172, %2, %cst_29 {dimension_numbers = #tpu.dot_dimension_numbers<[1], [0], [0], [1], [0, 0, 1, 1], [], []>} : vector<2x32xf32>, vector<32x96xf32>, vector<2x96xf32> -> vector<2x96xf32>
    %174 = arith.addf %173, %10 : vector<2x96xf32>
    %175 = vector.extract_strided_slice %7 {offsets = [14, 0], sizes = [2, 96], strides = [1, 1]} : vector<16x96xf32> to vector<2x96xf32>
    %176 = vector.extract_strided_slice %175 {offsets = [0, 0], sizes = [2, 64], strides = [1, 1]} : vector<2x96xf32> to vector<2x64xf32>
    %177 = vector.extract_strided_slice %174 {offsets = [0, 0], sizes = [2, 64], strides = [1, 1]} : vector<2x96xf32> to vector<2x64xf32>
    %178 = arith.addf %176, %177 : vector<2x64xf32>
    %179 = arith.negf %178 : vector<2x64xf32>
    %180 = math.exp %179 : vector<2x64xf32>
    %cst_30 = arith.constant 1.000000e+00 : f32
    %181 = vector.broadcast %cst_30 : f32 to vector<2x64xf32>
    %182 = arith.addf %181, %180 : vector<2x64xf32>
    %183 = arith.divf %181, %182 : vector<2x64xf32>
    %184 = vector.extract_strided_slice %183 {offsets = [0, 0], sizes = [2, 32], strides = [1, 1]} : vector<2x64xf32> to vector<2x32xf32>
    %185 = vector.extract_strided_slice %183 {offsets = [0, 32], sizes = [2, 32], strides = [1, 1]} : vector<2x64xf32> to vector<2x32xf32>
    %186 = vector.extract_strided_slice %175 {offsets = [0, 64], sizes = [2, 32], strides = [1, 1]} : vector<2x96xf32> to vector<2x32xf32>
    %187 = vector.extract_strided_slice %174 {offsets = [0, 64], sizes = [2, 32], strides = [1, 1]} : vector<2x96xf32> to vector<2x32xf32>
    %188 = arith.mulf %184, %187 : vector<2x32xf32>
    %189 = arith.addf %186, %188 : vector<2x32xf32>
    %190 = math.tanh %189 : vector<2x32xf32>
    %cst_31 = arith.constant 1.000000e+00 : f32
    %191 = vector.broadcast %cst_31 : f32 to vector<2x32xf32>
    %192 = arith.subf %191, %185 : vector<2x32xf32>
    %193 = arith.mulf %192, %190 : vector<2x32xf32>
    %194 = arith.mulf %185, %172 : vector<2x32xf32>
    %195 = arith.addf %193, %194 : vector<2x32xf32>
    %196 = tpu.concatenate %34, %57, %80, %103, %126, %149, %172, %195 in 0 : vector<2x32xf32>, vector<2x32xf32>, vector<2x32xf32>, vector<2x32xf32>, vector<2x32xf32>, vector<2x32xf32>, vector<2x32xf32>, vector<2x32xf32> -> vector<16x32xf32>
    %c0_32 = arith.constant 0 : index
    %c0_33 = arith.constant 0 : index
    %197 = vector.load %arg4[%c0_32, %c0_33] : memref<32x4xf32, #tpu.memory_space<vmem>>, vector<32x4xf32>
    %cst_34 = arith.constant dense<0.000000e+00> : vector<16x4xf32>
    %198 = tpu.matmul %196, %197, %cst_34 {dimension_numbers = #tpu.dot_dimension_numbers<[1], [0], [0], [1], [0, 0, 1, 1], [], []>} : vector<16x32xf32>, vector<32x4xf32>, vector<16x4xf32> -> vector<16x4xf32>
    %c0_35 = arith.constant 0 : index
    %c0_36 = arith.constant 0 : index
    %199 = vector.load %arg5[%c0_35, %c0_36] : memref<1x4xf32, #tpu.memory_space<vmem>>, vector<1x4xf32>
    %200 = vector.broadcast %199 : vector<1x4xf32> to vector<16x4xf32>
    %201 = arith.addf %198, %200 : vector<16x4xf32>
    %c0_37 = arith.constant 0 : index
    %c0_38 = arith.constant 0 : index
    %202 = vector.load %arg6[%c0_37, %c0_38] : memref<16x4xf32, #tpu.memory_space<vmem>>, vector<16x4xf32>
    tpu.vector_store %arg6[%c0_37, %c0_38], %201 {strides = array<i32>} : memref<16x4xf32, #tpu.memory_space<vmem>>, vector<16x4xf32>,
    return
  }
}

</mosaic_0001>

<bundles_post_ra>
// kernel: tpu_custom_call.1
= control target key start
LH: loop header
LB: loop body
LE: loop exit
PB: predicated region body
PF: predicated region fallthrough
CT: control target
= control target key end

     0   :  { %vm35_vm0 = vcmask 64512   ;;  %v1352_v0 = vmov 0.0|0.0   ;;  %vm1353_vm1 = vmmov 0   ;;  %v1354_v4 = vmov 0.0   ;;  %s1355_s10 = smov 64   ;;  %s1583_s2 = inlined_call_operand.vmem [shape: f32[32,96], index: 2, kind: input, shape index: {}]   ;;  %s1584_s1 = inlined_call_operand.vmem [shape: f32[8,96], index: 1, kind: input, shape index: {}]   ;;  %s1585_s0 = inlined_call_operand.vmem [shape: f32[16,8], index: 0, kind: input, shape index: {}]   ;;  %s1586_s3 = inlined_call_operand.vmem [shape: f32[2,96], index: 3, kind: input, shape index: {}]   ;;  %s1587_s4 = inlined_call_operand.vmem [shape: f32[32,4], index: 4, kind: input, shape index: {}]   ;;  %s1588_s5 = inlined_call_operand.vmem [shape: f32[1,4], index: 5, kind: input, shape index: {}]   ;;  %s1589_s6 = inlined_call_operand.vmem [shape: f32[16,4], index: 6, kind: output, shape index: {}]  }
   0x1   :  { %1243 = vmatprep.subr.bf16.mxu1 %v1352_v0  ;;  %v26_v1 = vld [vmem:[%s1583_s2] sm:$0xff]  ;;  %v27_v2 = vld [vmem:[%s1583_s2 + $0x8] sm:$0xff]  ;;  %1152 = vmatprep.mubr.msk.f32.mxu1 %vm1353_vm1, %v1354_v4  ;;  %v28_v6 = vld [vmem:[%s1583_s2 + $0x10] sm:$0xff]  ;;  %v31_v11 = vlaneseq  ;;  %vm121_vm2 = vcmask 261120   ;;  %vm958_vm3 = vcmask 1041408   ;;  %vm960_vm4 = vcmask 1043456  }
   0x2   :  { %v25_v3 = vld [vmem:[%s1584_s1] sm:$0xff]  ;;  %v1404_v5 = vpack.c.bf16 %v27_v2, %v26_v1  ;;  %v29_v7 = vld [vmem:[%s1583_s2 + $0x18] sm:$0xff]  ;;  %v24_v9 = vld [vmem:[%s1585_s0 + $0x8] sm:$0xff]  ;;  %vm962_vm5 = vcmask 1045504   ;;  %vm1063_vm6 = vcmask 31744  }
   0x3   :  { %1139 = vmatprep.subr.mxu0 %v25_v3  ;;  %v23_v8 = vld [vmem:[%s1585_s0] sm:$0xff]  ;;  %v1420_v10 = vpack.c.bf16 %v29_v7, %v28_v6  ;;  %v32_v12 = vshrl.u32 %v31_v11, 7 }
   0x4   :  { %1140 = vmatpush3.msra.mxu0 %v25_v3  ;;  %1141 = vmatprep.mubr.msk.f32.mxu0 %vm35_vm0, %v23_v8  ;;  %v30_v14 = vld [vmem:[%s1586_s3] sm:$0x3]  ;;  %s1356_s3 = smov 96  }
   0x5   :  { %1245 = vmatpush3.bf16.msra.mxu1 %v1404_v5  ;;  %1142 = vmatmul.mubr.msk.f32.vlgmr.msra.gmra.mrb[0].mxu0 %vm35_vm0, %v24_v9  ;;  %v33_v13 = vsub.s32 0, %v32_v12  ;;  %v119_v17 = vsub.s32 1, %v32_v12 }
   0x6   :  { %1246 = vmatprep.subr.bf16.mxu1 %v1352_v0  ;;  %1249 = vmatprep.subr.bf16.mxu0 %v1352_v0 }
   0x7   :  { %1251 = vmatpush3.bf16.msra.mxu0 %v1404_v5  ;;  %1163 = vmatprep.mubr.msk.f32.mxu0 %vm1353_vm1, %v1354_v4  ;;  %v34_v15 = vrot.slane %v30_v14, %v33_v13  ;;  %v1445_v20 = vrot.slane %v30_v14, %v119_v17 }
   0x8   :  { %1252 = vmatprep.subr.bf16.mxu0 %v1352_v0 }
   0x9   :  { %1248 = vmatpush3.bf16.msra.mxu1 %v1420_v10 }
   0xa   :  { %1255 = vmatprep.subr.bf16.mxu1 %v1352_v0 }
   0xb   :  { %1254 = vmatpush3.bf16.msra.mxu0 %v1420_v10 }
   0xc   :  { %1153 = vmatmul.mubr.f32.vlgmr.msra.gmra.mrb[0].mxu1 %v1354_v4  ;;  %1261 = vmatprep.subr.bf16.mxu0 %v1352_v0 }
   0xd   :  { %1257 = vmatpush3.bf16.msra.mxu1 %v1404_v5  ;;  %1174 = vmatprep.mubr.msk.f32.mxu1 %vm1353_vm1, %v1354_v4 }
   0xe   :  { %1258 = vmatprep.subr.bf16.mxu1 %v1352_v0 }
  0x11   :  { %1260 = vmatpush3.bf16.msra.mxu1 %v1420_v10 }
  0x12   :  { %1267 = vmatprep.subr.bf16.mxu1 %v1352_v0 }
  0xd8   :  { %v1143_v16 = vpop.f32.mrb[0].mxu0 }
  0xd9   :  { %v1443_v18 = vadd.f32 %v1143_v16, %v34_v15  ;;  %v108_v19 = vpop.f32.mrb[1].mxu0 }
  0xda   :  { %v1449_v24 = vadd.f32 %v108_v19, %v34_v15 }
  0xdf   :  { %v191_v21 = vpop.f32.mrb[0].mxu1 }
  0xe0   :  { %v192_v22 = vadd.f32 %v191_v21, %v1445_v20  ;;  %v1154_v23 = vpop.f32.mrb[1].mxu1 }
  0xe2   :  { %203 = vrot.lane.b32.xlu0 %v192_v22, %s1355_s10  ;;  %v195_v25 = vadd.f32 %v192_v22, %v1449_v24 }
  0xe4   :  { %v1072_v26 = vmul.f32 -1.442695, %v195_v25 }
  0xe6   :  { %1304 = vpow2.f32 %v1072_v26 }
  0xf0   :  { %v1305_v27 = vpop.eup %1304 }
  0xf1   :  { %v199_v28 = vadd.f32 1.0, %v1305_v27 }
  0xf3   :  { %1306 = vrcp.f32 %v199_v28 }
  0xfd   :  { %v1307_v29 = vpop.eup %1306 }
  0xfe   :  { %v213_v35 = vsub.f32 1.0, %v1307_v29  ;;  %v219_v37 = vmul.f32 0.0, %v1307_v29 }
 0x154   :  { %v204_v30 = vpop.permute.xlu0 %203 }
 0x155   :  { %v206_v31 = vmul.f32 %v1307_v29, %v204_v30 }
 0x157   :  { %208 = vrot.lane.b32.xlu0 %v206_v31, %s1355_s10 }
 0x1c9   :  { %v209_v32 = vpop.permute.xlu0 %208 }
 0x1ca   :  { %v211_v33 = vadd.f32 %v209_v32, %v1449_v24 }
 0x1cc   :  { %1308 = vtanh.f32 %v211_v33 }
 0x1d6   :  { %v1309_v34 = vpop.eup %1308 }
 0x1d7   :  { %215 = vrot.lane.b32.xlu1 %v1309_v34, %s1356_s3 }
 0x249   :  { %v216_v36 = vpop.permute.xlu1 %215 }
 0x24a   :  { %v218_v38 = vmul.f32 %v216_v36, %v213_v35 }
 0x24c   :  { %v1455_v39 = vadd.f32 %v219_v37, %v218_v38 }
 0x24e   :  { %222 = vrot.lane.b32.xlu1 %v1455_v39, %s1356_s3  ;;  %v322_v56 = vrot.slane %v1455_v39, 6 }
 0x2c0   :  { %v223_v40 = vpop.permute.xlu1 %222 }
 0x2c1   :  { %1164 = vmatmul.mubr.msk.f32.vlgmr.msra.gmra.mrb[2].mxu0 %vm121_vm2, %v223_v40 }
 0x2c2   :  { %1263 = vmatpush3.bf16.msra.mxu0 %v1404_v5  ;;  %1185 = vmatprep.mubr.msk.f32.mxu0 %vm1353_vm1, %v1354_v4 }
 0x2c3   :  { %1264 = vmatprep.subr.bf16.mxu0 %v1352_v0 }
 0x2c6   :  { %1266 = vmatpush3.bf16.msra.mxu0 %v1420_v10 }
 0x2c7   :  { %1273 = vmatprep.subr.bf16.mxu0 %v1352_v0 }
 0x394   :  { %v292_v41 = vpop.f32.mrb[2].mxu0 }
 0x395   :  { %v293_v42 = vadd.f32 %v292_v41, %v1445_v20  ;;  %v1165_v43 = vpop.f32.mrb[3].mxu0 }
 0x397   :  { %v297_v44 = vrot.slane %v293_v42, 6 }
 0x399   :  { %306 = vrot.lane.b32.xlu0 %v297_v44, %s1355_s10  ;;  %v299_v45 = vadd.f32 %v297_v44, %v1449_v24 }
 0x39b   :  { %v1074_v46 = vmul.f32 -1.442695, %v299_v45 }
 0x39d   :  { %1310 = vpow2.f32 %v1074_v46 }
 0x3a7   :  { %v1311_v47 = vpop.eup %1310 }
 0x3a8   :  { %v303_v48 = vadd.f32 1.0, %v1311_v47 }
 0x3aa   :  { %1312 = vrcp.f32 %v303_v48 }
 0x3b4   :  { %v1313_v49 = vpop.eup %1312 }
 0x3b5   :  { %v316_v55 = vsub.f32 1.0, %v1313_v49  ;;  %v324_v59 = vmul.f32 %v1313_v49, %v322_v56 }
 0x40b   :  { %v307_v50 = vpop.permute.xlu0 %306 }
 0x40c   :  { %v309_v51 = vmul.f32 %v1313_v49, %v307_v50 }
 0x40e   :  { %311 = vrot.lane.b32.xlu1 %v309_v51, %s1355_s10 }
 0x480   :  { %v312_v52 = vpop.permute.xlu1 %311 }
 0x481   :  { %v314_v53 = vadd.f32 %v312_v52, %v1449_v24 }
 0x483   :  { %1314 = vtanh.f32 %v314_v53 }
 0x48d   :  { %v1315_v54 = vpop.eup %1314 }
 0x48e   :  { %318 = vrot.lane.b32.xlu0 %v1315_v54, %s1356_s3 }
 0x500   :  { %v319_v57 = vpop.permute.xlu0 %318 }
 0x501   :  { %v321_v58 = vmul.f32 %v319_v57, %v316_v55 }
 0x503   :  { %v325_v60 = vadd.f32 %v324_v59, %v321_v58 }
 0x505   :  { %v327_v61 = vrot.slane %v325_v60, 2  ;;  %v428_v19 = vrot.slane %v325_v60, 6  ;;  %v959_v26 = vsel %vm958_vm3, %v1455_v39, %v325_v60 }
 0x507   :  { %328 = vrot.lane.b32.xlu1 %v327_v61, %s1356_s3 }
 0x579   :  { %v329_v62 = vpop.permute.xlu1 %328 }
 0x57a   :  { %1175 = vmatmul.mubr.msk.f32.vlgmr.msra.gmra.mrb[2].mxu1 %vm121_vm2, %v329_v62 }
 0x57b   :  { %1269 = vmatpush3.bf16.msra.mxu1 %v1404_v5  ;;  %1196 = vmatprep.mubr.msk.f32.mxu1 %vm1353_vm1, %v1354_v4 }
 0x57c   :  { %1270 = vmatprep.subr.bf16.mxu1 %v1352_v0 }
 0x57f   :  { %1272 = vmatpush3.bf16.msra.mxu1 %v1420_v10 }
 0x580   :  { %1279 = vmatprep.subr.bf16.mxu1 %v1352_v0 }
 0x64d   :  { %v398_v63 = vpop.f32.mrb[2].mxu1 }
 0x64e   :  { %v399_v1 = vadd.f32 %v398_v63, %v1445_v20  ;;  %v1176_v2 = vpop.f32.mrb[3].mxu1 }
 0x650   :  { %v403_v3 = vrot.slane %v399_v1, 4 }
 0x652   :  { %412 = vrot.lane.b32.xlu0 %v403_v3, %s1355_s10  ;;  %v405_v6 = vadd.f32 %v403_v3, %v1449_v24 }
 0x654   :  { %v1076_v7 = vmul.f32 -1.442695, %v405_v6 }
 0x656   :  { %1316 = vpow2.f32 %v1076_v7 }
 0x660   :  { %v1317_v8 = vpop.eup %1316 }
 0x661   :  { %v409_v9 = vadd.f32 1.0, %v1317_v8 }
 0x663   :  { %1318 = vrcp.f32 %v409_v9 }
 0x66d   :  { %v1319_v11 = vpop.eup %1318 }
 0x66e   :  { %v422_v17 = vsub.f32 1.0, %v1319_v11  ;;  %v430_v22 = vmul.f32 %v1319_v11, %v428_v19 }
 0x6c4   :  { %v413_v12 = vpop.permute.xlu0 %412 }
 0x6c5   :  { %v415_v13 = vmul.f32 %v1319_v11, %v413_v12 }
 0x6c7   :  { %417 = vrot.lane.b32.xlu1 %v415_v13, %s1355_s10 }
 0x739   :  { %v418_v14 = vpop.permute.xlu1 %417 }
 0x73a   :  { %v420_v15 = vadd.f32 %v418_v14, %v1449_v24 }
 0x73c   :  { %1320 = vtanh.f32 %v420_v15 }
 0x746   :  { %v1321_v16 = vpop.eup %1320 }
 0x747   :  { %424 = vrot.lane.b32.xlu0 %v1321_v16, %s1356_s3 }
 0x7b9   :  { %v425_v21 = vpop.permute.xlu0 %424 }
 0x7ba   :  { %v427_v23 = vmul.f32 %v425_v21, %v422_v17 }
 0x7bc   :  { %v431_v25 = vadd.f32 %v430_v22, %v427_v23 }
 0x7be   :  { %v433_v27 = vrot.slane %v431_v25, 4  ;;  %v961_v28 = vsel %vm960_vm4, %v959_v26, %v431_v25  ;;  %v534_v45 = vrot.slane %v431_v25, 6 }
 0x7c0   :  { %434 = vrot.lane.b32.xlu1 %v433_v27, %s1356_s3 }
 0x832   :  { %v435_v29 = vpop.permute.xlu1 %434 }
 0x833   :  { %1186 = vmatmul.mubr.msk.f32.vlgmr.msra.gmra.mrb[4].mxu0 %vm121_vm2, %v435_v29 }
 0x834   :  { %1275 = vmatpush3.bf16.msra.mxu0 %v1404_v5  ;;  %1207 = vmatprep.mubr.msk.f32.mxu0 %vm1353_vm1, %v1354_v4 }
 0x835   :  { %1276 = vmatprep.subr.bf16.mxu0 %v1352_v0 }
 0x838   :  { %1278 = vmatpush3.bf16.msra.mxu0 %v1420_v10 }
 0x839   :  { %1285 = vmatprep.subr.bf16.mxu0 %v1352_v0 }
 0x906   :  { %v504_v30 = vpop.f32.mrb[4].mxu0 }
 0x907   :  { %v505_v31 = vadd.f32 %v504_v30, %v1445_v20  ;;  %v1187_v32 = vpop.f32.mrb[5].mxu0 }
 0x909   :  { %v509_v33 = vrot.slane %v505_v31, 2 }
 0x90b   :  { %518 = vrot.lane.b32.xlu0 %v509_v33, %s1355_s10  ;;  %v511_v34 = vadd.f32 %v509_v33, %v1449_v24 }
 0x90d   :  { %v1078_v35 = vmul.f32 -1.442695, %v511_v34 }
 0x90f   :  { %1322 = vpow2.f32 %v1078_v35 }
 0x919   :  { %v1323_v36 = vpop.eup %1322 }
 0x91a   :  { %v515_v37 = vadd.f32 1.0, %v1323_v36 }
 0x91c   :  { %1324 = vrcp.f32 %v515_v37 }
 0x926   :  { %v1325_v38 = vpop.eup %1324 }
 0x927   :  { %v528_v44 = vsub.f32 1.0, %v1325_v38  ;;  %v536_v47 = vmul.f32 %v1325_v38, %v534_v45 }
 0x97d   :  { %v519_v39 = vpop.permute.xlu0 %518 }
 0x97e   :  { %v521_v40 = vmul.f32 %v1325_v38, %v519_v39 }
 0x980   :  { %523 = vrot.lane.b32.xlu1 %v521_v40, %s1355_s10 }
 0x9f2   :  { %v524_v41 = vpop.permute.xlu1 %523 }
 0x9f3   :  { %v526_v42 = vadd.f32 %v524_v41, %v1449_v24 }
 0x9f5   :  { %1326 = vtanh.f32 %v526_v42 }
 0x9ff   :  { %v1327_v43 = vpop.eup %1326 }
 0xa00   :  { %530 = vrot.lane.b32.xlu0 %v1327_v43, %s1356_s3 }
 0xa72   :  { %v531_v46 = vpop.permute.xlu0 %530 }
 0xa73   :  { %v533_v48 = vmul.f32 %v531_v46, %v528_v44 }
 0xa75   :  { %v537_v49 = vadd.f32 %v536_v47, %v533_v48 }
 0xa77   :  { %v539_v50 = vrot.slane %v537_v49, 6  ;;  %v1505_v51 = vsel %vm962_vm5, %v961_v28, %v537_v49 }
 0xa79   :  { %540 = vrot.lane.b32.xlu1 %v539_v50, %s1356_s3 }
 0xaeb   :  { %v541_v52 = vpop.permute.xlu1 %540 }
 0xaec   :  { %1197 = vmatmul.mubr.msk.f32.vlgmr.msra.gmra.mrb[4].mxu1 %vm121_vm2, %v541_v52 }
 0xaed   :  { %1281 = vmatpush3.bf16.msra.mxu1 %v1404_v5  ;;  %1218 = vmatprep.mubr.msk.f32.mxu1 %vm1353_vm1, %v1354_v4 }
 0xaee   :  { %1282 = vmatprep.subr.bf16.mxu1 %v1352_v0 }
 0xaf1   :  { %1284 = vmatpush3.bf16.msra.mxu1 %v1420_v10 }
 0xbbf   :  { %v610_v24 = vpop.f32.mrb[4].mxu1 }
 0xbc0   :  { %v611_v53 = vadd.f32 %v610_v24, %v1445_v20  ;;  %v1198_v54 = vpop.f32.mrb[5].mxu1 }
 0xbc2   :  { %622 = vrot.lane.b32.xlu0 %v611_v53, %s1355_s10  ;;  %v614_v55 = vadd.f32 %v611_v53, %v1443_v18 }
 0xbc4   :  { %v1080_v56 = vmul.f32 -1.442695, %v614_v55 }
 0xbc6   :  { %1328 = vpow2.f32 %v1080_v56 }
 0xbd0   :  { %v1329_v57 = vpop.eup %1328 }
 0xbd1   :  { %v618_v58 = vadd.f32 1.0, %v1329_v57 }
 0xbd3   :  { %1330 = vrcp.f32 %v618_v58 }
 0xbdd   :  { %v1331_v59 = vpop.eup %1330 }
 0xbde   :  { %v632_v2 = vsub.f32 1.0, %v1331_v59  ;;  %v639_v6 = vmul.f32 %v1331_v59, %v539_v50 }
 0xc34   :  { %v623_v60 = vpop.permute.xlu0 %622 }
 0xc35   :  { %v625_v61 = vmul.f32 %v1331_v59, %v623_v60 }
 0xc37   :  { %627 = vrot.lane.b32.xlu1 %v625_v61, %s1355_s10 }
 0xca9   :  { %v628_v62 = vpop.permute.xlu1 %627 }
 0xcaa   :  { %v630_v63 = vadd.f32 %v628_v62, %v1443_v18 }
 0xcac   :  { %1332 = vtanh.f32 %v630_v63 }
 0xcb6   :  { %v1333_v1 = vpop.eup %1332 }
 0xcb7   :  { %634 = vrot.lane.b32.xlu0 %v1333_v1, %s1356_s3 }
 0xd29   :  { %v635_v3 = vpop.permute.xlu0 %634 }
 0xd2a   :  { %v637_v7 = vmul.f32 %v635_v3, %v632_v2 }
 0xd2c   :  { %v1520_v8 = vadd.f32 %v639_v6, %v637_v7 }
 0xd2e   :  { %642 = vrot.lane.b32.xlu1 %v1520_v8, %s1356_s3  ;;  %v742_v25 = vrot.slane %v1520_v8, 6 }
 0xda0   :  { %v643_v9 = vpop.permute.xlu1 %642 }
 0xda1   :  { %1208 = vmatmul.mubr.msk.f32.vlgmr.msra.gmra.mrb[6].mxu0 %vm121_vm2, %v643_v9  ;;  %v968_v9 = vld [vmem:[%s1587_s4 + $0x8] sm:$0xff] }
 0xda2   :  { %1287 = vmatpush3.bf16.msra.mxu0 %v1404_v5  ;;  %1229 = vmatprep.mubr.msk.f32.mxu0 %vm1353_vm1, %v1354_v4 }
 0xda3   :  { %1288 = vmatprep.subr.bf16.mxu0 %v1352_v0 }
 0xda6   :  { %1290 = vmatpush3.bf16.msra.mxu0 %v1420_v10 }
 0xe74   :  { %v712_v11 = vpop.f32.mrb[6].mxu0 }
 0xe75   :  { %v713_v12 = vadd.f32 %v712_v11, %v1445_v20  ;;  %v1209_v13 = vpop.f32.mrb[7].mxu0  ;;  %v969_v11 = vld [vmem:[%s1587_s4 + $0x10] sm:$0xff] }
 0xe77   :  { %v717_v14 = vrot.slane %v713_v12, 6 }
 0xe79   :  { %726 = vrot.lane.b32.xlu0 %v717_v14, %s1355_s10  ;;  %v719_v15 = vadd.f32 %v717_v14, %v1443_v18 }
 0xe7b   :  { %v1082_v16 = vmul.f32 -1.442695, %v719_v15 }
 0xe7d   :  { %1334 = vpow2.f32 %v1082_v16 }
 0xe87   :  { %v1335_v17 = vpop.eup %1334 }
 0xe88   :  { %v723_v5 = vadd.f32 1.0, %v1335_v17 }
 0xe8a   :  { %1336 = vrcp.f32 %v723_v5 }
 0xe94   :  { %v1337_v19 = vpop.eup %1336 }
 0xe95   :  { %v736_v23 = vsub.f32 1.0, %v1337_v19  ;;  %v744_v28 = vmul.f32 %v1337_v19, %v742_v25 }
 0xeeb   :  { %v727_v4 = vpop.permute.xlu0 %726 }
 0xeec   :  { %v729_v21 = vmul.f32 %v1337_v19, %v727_v4 }
 0xeee   :  { %731 = vrot.lane.b32.xlu1 %v729_v21, %s1355_s10 }
 0xf60   :  { %v732_v0 = vpop.permute.xlu1 %731 }
 0xf61   :  { %v734_v10 = vadd.f32 %v732_v0, %v1443_v18  ;;  %v1087_v0 = vld [vmem:[%s1588_s5] ss:$0 sm:$0xff] }
 0xf63   :  { %1338 = vtanh.f32 %v734_v10 }
 0xf6d   :  { %v1339_v22 = vpop.eup %1338 }
 0xf6e   :  { %738 = vrot.lane.b32.xlu0 %v1339_v22, %s1356_s3 }
 0xfe0   :  { %v739_v26 = vpop.permute.xlu0 %738 }
 0xfe1   :  { %v741_v27 = vmul.f32 %v739_v26, %v736_v23 }
 0xfe3   :  { %v745_v29 = vadd.f32 %v744_v28, %v741_v27 }
 0xfe5   :  { %v747_v30 = vrot.slane %v745_v29, 2  ;;  %v848_v47 = vrot.slane %v745_v29, 6  ;;  %v964_v24 = vsel %vm958_vm3, %v1520_v8, %v745_v29  ;;  %v967_v8 = vld [vmem:[%s1587_s4] sm:$0xff] }
 0xfe7   :  { %748 = vrot.lane.b32.xlu1 %v747_v30, %s1356_s3 }
0x1059   :  { %v749_v31 = vpop.permute.xlu1 %748 }
0x105a   :  { %1219 = vmatmul.mubr.msk.f32.vlgmr.msra.gmra.mrb[6].mxu1 %vm121_vm2, %v749_v31 }
0x112d   :  { %v818_v32 = vpop.f32.mrb[6].mxu1 }
0x112e   :  { %v819_v33 = vadd.f32 %v818_v32, %v1445_v20  ;;  %v1220_v34 = vpop.f32.mrb[7].mxu1 }
0x1130   :  { %v823_v35 = vrot.slane %v819_v33, 4 }
0x1132   :  { %832 = vrot.lane.b32.xlu0 %v823_v35, %s1355_s10  ;;  %v825_v36 = vadd.f32 %v823_v35, %v1443_v18 }
0x1134   :  { %v1084_v37 = vmul.f32 -1.442695, %v825_v36 }
0x1136   :  { %1340 = vpow2.f32 %v1084_v37 }
0x1140   :  { %v1341_v38 = vpop.eup %1340 }
0x1141   :  { %v829_v39 = vadd.f32 1.0, %v1341_v38 }
0x1143   :  { %1342 = vrcp.f32 %v829_v39 }
0x114d   :  { %v1343_v40 = vpop.eup %1342 }
0x114e   :  { %v842_v46 = vsub.f32 1.0, %v1343_v40  ;;  %v850_v49 = vmul.f32 %v1343_v40, %v848_v47 }
0x11a4   :  { %v833_v41 = vpop.permute.xlu0 %832 }
0x11a5   :  { %v835_v42 = vmul.f32 %v1343_v40, %v833_v41 }
0x11a7   :  { %837 = vrot.lane.b32.xlu1 %v835_v42, %s1355_s10 }
0x1219   :  { %v838_v43 = vpop.permute.xlu1 %837 }
0x121a   :  { %v840_v44 = vadd.f32 %v838_v43, %v1443_v18 }
0x121c   :  { %1344 = vtanh.f32 %v840_v44 }
0x1226   :  { %v1345_v45 = vpop.eup %1344 }
0x1227   :  { %844 = vrot.lane.b32.xlu0 %v1345_v45, %s1356_s3 }
0x1299   :  { %v845_v48 = vpop.permute.xlu0 %844 }
0x129a   :  { %v847_v50 = vmul.f32 %v845_v48, %v842_v46 }
0x129c   :  { %v851_v52 = vadd.f32 %v850_v49, %v847_v50 }
0x129e   :  { %v853_v53 = vrot.slane %v851_v52, 4  ;;  %v965_v54 = vsel %vm960_vm4, %v964_v24, %v851_v52  ;;  %v954_v15 = vrot.slane %v851_v52, 6 }
0x12a0   :  { %854 = vrot.lane.b32.xlu1 %v853_v53, %s1356_s3 }
0x1312   :  { %v855_v55 = vpop.permute.xlu1 %854 }
0x1313   :  { %1230 = vmatmul.mubr.msk.f32.vlgmr.msra.gmra.mrb[8].mxu0 %vm121_vm2, %v855_v55 }
0x13e6   :  { %v924_v56 = vpop.f32.mrb[8].mxu0 }
0x13e7   :  { %v925_v57 = vadd.f32 %v924_v56, %v1445_v20  ;;  %v1231_v58 = vpop.f32.mrb[9].mxu0 }
0x13e9   :  { %v929_v59 = vrot.slane %v925_v57, 2 }
0x13eb   :  { %938 = vrot.lane.b32.xlu0 %v929_v59, %s1355_s10  ;;  %v931_v60 = vadd.f32 %v929_v59, %v1443_v18 }
0x13ed   :  { %v1086_v61 = vmul.f32 -1.442695, %v931_v60 }
0x13ef   :  { %1346 = vpow2.f32 %v1086_v61 }
0x13f9   :  { %v1347_v62 = vpop.eup %1346 }
0x13fa   :  { %v935_v63 = vadd.f32 1.0, %v1347_v62 }
0x13fc   :  { %1348 = vrcp.f32 %v935_v63 }
0x1406   :  { %v1349_v1 = vpop.eup %1348 }
0x1407   :  { %v948_v14 = vsub.f32 1.0, %v1349_v1  ;;  %v956_v17 = vmul.f32 %v1349_v1, %v954_v15 }
0x145d   :  { %v939_v2 = vpop.permute.xlu0 %938 }
0x145e   :  { %v941_v3 = vmul.f32 %v1349_v1, %v939_v2 }
0x1460   :  { %943 = vrot.lane.b32.xlu1 %v941_v3, %s1355_s10 }
0x1464   :  { %980 = vrot.lane.b32.xlu1 %v1505_v51, %s1356_s3  ;;  %v1291_v51 = vpack.c.bf16 %v968_v9, %v967_v8 }
0x1466   :  { %1292 = vmatprep.subr.bf16.mxu1 %v1291_v51 }
0x1467   :  { %1294 = vmatpush3.bf16.msra.mxu1 %v1291_v51 }
0x14d2   :  { %v944_v20 = vpop.permute.xlu1 %943 }
0x14d3   :  { %v946_v6 = vadd.f32 %v944_v20, %v1443_v18  ;;  %v970_v18 = vld [vmem:[%s1587_s4 + $0x18] sm:$0xff] }
0x14d4   :  { %v1295_v12 = vpack.c.bf16 %v970_v18, %v969_v11 }
0x14d5   :  { %1350 = vtanh.f32 %v946_v6 }
0x14d6   :  { %v981_v7 = vpop.permute.xlu1 %980  ;;  %1296 = vmatprep.subr.bf16.mxu1 %v1295_v12 }
0x14d7   :  { %1240 = vmatprep.mubr.msk.f32.mxu1 %vm121_vm2, %v981_v7  ;;  %1298 = vmatpush3.bf16.msra.mxu1 %v1295_v12 }
0x14df   :  { %v1351_v13 = vpop.eup %1350 }
0x14e0   :  { %950 = vrot.lane.b32.xlu0 %v1351_v13, %s1356_s3 }
0x1552   :  { %v951_v16 = vpop.permute.xlu0 %950 }
0x1553   :  { %v953_v5 = vmul.f32 %v951_v16, %v948_v14 }
0x1555   :  { %v957_v19 = vadd.f32 %v956_v17, %v953_v5 }
0x1557   :  { %v966_v4 = vsel %vm962_vm5, %v965_v54, %v957_v19 }
0x1558   :  { %982 = vrot.lane.b32.xlu0 %v966_v4, %s1356_s3 }
0x15ca   :  { %v983_v21 = vpop.permute.xlu0 %982 }
0x15cb   :  { %1241 = vmatmul.mubr.msk.f32.vlgmr.msra.gmra.mrb[8].mxu1 %vm121_vm2, %v983_v21 }
0x169e   :  { %v1242_v10 = vpop.f32.mrb[8].mxu1 }
0x169f   :  { %v1060_v22 = vadd.f32 %v1242_v10, %v1087_v0  ;;  %v1054_v23 = vpop.f32.mrb[9].mxu1 }
0x16a0   :  { %v1055_v25 = vadd.f32 %v1087_v0, %v1054_v23 }
0x16a1   :  { %1065 = vst.msk [vmem:[%s1589_s6 + $0x8] sm:$0xff] %vm1063_vm6, %v1060_v22 }
0x16a2   :  { %1064 = vst.msk [vmem:[%s1589_s6] sm:$0xff] %vm1063_vm6, %v1055_v25 }

</bundles_post_ra>
